<compile_context>
chip_gen: v7x
topology: tpu7x:2x2x1
jax: 0.10.0
libtpu: 0.0.40
codegen_flags: <defaults>
</compile_context>

<pallas_src>
import functools
import math

import jax
import jax.numpy as jnp
from jax.experimental import pallas as pl
from jax.experimental.pallas import tpu as pltpu

LOG_STD_MAX = 2.0
LOG_STD_MIN = -20.0
LOG_STD_HALF = 0.5 * (LOG_STD_MAX - LOG_STD_MIN)   # 11.0
LOG_STD_MID = 0.5 * (LOG_STD_MAX + LOG_STD_MIN)    # -9.0
HIDDEN_DIM = 128
LN_EPS = 1e-5  # PyTorch nn.LayerNorm default eps


def _round_up(x, m):
    return ((x + m - 1) // m) * m


def _layernorm(x, gamma, beta):
    # E[x^2] - mu^2 form: the two reductions are independent (overlap on the
    # XLU) and the epilogue is a single multiply-add per element.
    mu = jnp.mean(x, axis=-1, keepdims=True)
    ms = jnp.mean(x * x, axis=-1, keepdims=True)
    var = jnp.maximum(ms - mu * mu, 0.0)
    inv = jax.lax.rsqrt(var + LN_EPS)
    scale = gamma * inv
    return x * scale + (beta - mu * scale)


def _weight_names(use_MLP_ReLU, use_Residual, use_LayerNorm):
    """Large (bf16) weights this config actually uses, in kernel-arg order."""
    names = ["w1"]
    if use_MLP_ReLU:
        names += ["w2"]
    else:
        if use_Residual:
            names += ["wb1", "wb2"]
    names += ["wh"]  # fused (mean | log_std) head
    return names


def _stack_layout(use_MLP_ReLU, use_Residual, use_LayerNorm, head_rows):
    """Ordered (name, n_rows) layout of the fused (n_rows, 128) f32 bias/LN stack."""
    rows = [("b1", 1)]
    if use_MLP_ReLU:
        rows += [("b2", 1)]
    else:
        if use_Residual:
            rows += [("lng1", 1), ("lnb1", 1), ("bb1", 4), ("bb2", 1)]
        if use_LayerNorm:
            rows += [("lng2", 1), ("lnb2", 1)]
    rows += [("bh", head_rows)]
    return rows


def make_actor_kernel(weight_names, stack_rows, use_MLP_ReLU, use_Residual,
                      use_LayerNorm, logstd_off):
    """Builds the kernel body; flags / layout / offsets are static (Python)."""
    bf16 = jnp.bfloat16
    n_w = len(weight_names)

    offs = {}
    r = 0
    for name, n in stack_rows:
        offs[name] = (r, n)
        r += n

    def row(stack, name):
        r0, n = offs[name]
        if n == 1:
            return stack[r0:r0 + 1, :]
        # Multi-row params (e.g. the (1, 512) residual bias) are stored as n
        # stacked 128-lane rows; re-join them along lanes (row-major match).
        return jnp.concatenate(
            [stack[r0 + i:r0 + i + 1, :] for i in range(n)], axis=1)

    def kernel(state_ref, *refs):
        w = dict(zip(weight_names, refs[:n_w]))
        stack = refs[n_w][...]          # (n_rows, 128) f32
        out_ref = refs[n_w + 1]

        s = state_ref[...]              # f32 (tile_b, k_pad); padding is zero
        x = jnp.dot(s.astype(bf16), w["w1"][...],
                    preferred_element_type=jnp.float32) + row(stack, "b1")

        if use_MLP_ReLU:
            x = jnp.maximum(x, 0.0)
            x = jnp.dot(x.astype(bf16), w["w2"][...],
                        preferred_element_type=jnp.float32) + row(stack, "b2")
            x = jnp.maximum(x, 0.0)
        else:
            # TODO(synk): use_RSNorm path not ported — RunningNorm is undefined
            # in the reference source; the wrapper rejects the flag.
            if use_Residual:
                residual = x
                h = _layernorm(x, row(stack, "lng1"), row(stack, "lnb1"))
                h = jnp.dot(h.astype(bf16), w["wb1"][...],
                            preferred_element_type=jnp.float32) + row(stack, "bb1")
                h = jnp.maximum(h, 0.0)
                h = jnp.dot(h.astype(bf16), w["wb2"][...],
                            preferred_element_type=jnp.float32) + row(stack, "bb2")
                x = h + residual
            if use_LayerNorm:
                x = _layernorm(x, row(stack, "lng2"), row(stack, "lnb2"))

        # Single lane-dense head slab: mean lanes raw, log_std lanes squashed.
        head = jnp.dot(x.astype(bf16), w["wh"][...],
                       preferred_element_type=jnp.float32) + row(stack, "bh")
        lane = jax.lax.broadcasted_iota(jnp.int32, head.shape, 1)
        squashed = LOG_STD_MID + LOG_STD_HALF * jnp.tanh(head)
        out_ref[...] = jnp.where(lane >= logstd_off, squashed, head)

    return kernel


def init_params(key, state_dim, action_dim, hidden_dim=HIDDEN_DIM):
    """Deterministic PyTorch-style init: U(-1/sqrt(fan_in), 1/sqrt(fan_in)), f32."""

    def linear(k, fan_in, fan_out):
        kw, kb = jax.random.split(k)
        bound = 1.0 / jnp.sqrt(jnp.float32(fan_in))
        w = jax.random.uniform(kw, (fan_in, fan_out), jnp.float32, -bound, bound)
        b = jax.random.uniform(kb, (1, fan_out), jnp.float32, -bound, bound)
        return w, b

    ks = jax.random.split(key, 6)
    w1, b1 = linear(ks[0], state_dim, hidden_dim)
    w2, b2 = linear(ks[1], hidden_dim, hidden_dim)
    wb1, bb1 = linear(ks[2], hidden_dim, 4 * hidden_dim)
    wb2, bb2 = linear(ks[3], 4 * hidden_dim, hidden_dim)
    w3, b3 = linear(ks[4], hidden_dim, action_dim)
    w4, b4 = linear(ks[5], hidden_dim, action_dim)

    lng1 = jnp.ones((1, hidden_dim), jnp.float32)
    lnb1 = jnp.zeros((1, hidden_dim), jnp.float32)
    lng2 = jnp.ones((1, hidden_dim), jnp.float32)
    lnb2 = jnp.zeros((1, hidden_dim), jnp.float32)

    return (w1, b1, w2, b2, lng1, lnb1, wb1, bb1, wb2, bb2,
            lng2, lnb2, w3, b3, w4, b4)


def pack_params(raw_params, state_dim, action_dim, *, use_MLP_ReLU=False,
                use_Residual=False, use_LayerNorm=False):
    """One-time packing: select used params, pad to MXU-friendly shapes, cast
    big weights to bf16, fuse all small f32 rows into one (n_rows, 128) stack."""
    (w1, b1, w2, b2, lng1, lnb1, wb1, bb1, wb2, bb2,
     lng2, lnb2, w3, b3, w4, b4) = raw_params

    H = HIDDEN_DIM
    bf16 = jnp.bfloat16
    k_pad = _round_up(max(state_dim, 128), 128)

    if action_dim <= 64:
        head_width, logstd_off = 128, 64        # single 128-lane slab
    else:
        a_pad = _round_up(action_dim, 128)
        head_width, logstd_off = 2 * a_pad, a_pad
    head_rows = head_width // 128

    w1p = jnp.zeros((k_pad, H), jnp.float32).at[:state_dim, :].set(w1).astype(bf16)

    wh = jnp.zeros((H, head_width), jnp.float32)
    wh = wh.at[:, :action_dim].set(w3)
    wh = wh.at[:, logstd_off:logstd_off + action_dim].set(w4)
    wh = wh.astype(bf16)
    bh = jnp.zeros((1, head_width), jnp.float32)
    bh = bh.at[:, :action_dim].set(b3)
    bh = bh.at[:, logstd_off:logstd_off + action_dim].set(b4)

    wdict = {"w1": w1p, "w2": w2.astype(bf16),
             "wb1": wb1.astype(bf16), "wb2": wb2.astype(bf16), "wh": wh}
    rowdict = {"b1": b1, "b2": b2, "lng1": lng1, "lnb1": lnb1,
               "bb1": bb1.reshape(4, H), "bb2": bb2,
               "lng2": lng2, "lnb2": lnb2, "bh": bh.reshape(head_rows, H)}

    weight_names = _weight_names(use_MLP_ReLU, use_Residual, use_LayerNorm)
    stack_rows = _stack_layout(use_MLP_ReLU, use_Residual, use_LayerNorm,
                               head_rows)
    stack = jnp.concatenate(
        [rowdict[name].reshape(n, H) for name, n in stack_rows], axis=0)

    return tuple(wdict[n] for n in weight_names) + (stack,)


@functools.partial(jax.jit, static_argnames=("action_dim", "use_MLP_ReLU",
                                             "use_Residual", "use_LayerNorm",
                                             "use_RSNorm"))
def actor_sac_forward(state, packed_params, *, action_dim, use_MLP_ReLU=False,
                      use_Residual=False, use_LayerNorm=False, use_RSNorm=False):
    if use_RSNorm:
        # TODO(synk): RunningNorm is not defined in the reference source; refuse
        # the flag rather than silently ignoring it.
        raise NotImplementedError("use_RSNorm (RunningNorm) is not supported.")

    B, K = state.shape
    H = HIDDEN_DIM
    weights = packed_params[:-1]
    stack = packed_params[-1]
    k_pad = weights[0].shape[0]                 # padded state_dim (w1 rows)
    head_width = weights[-1].shape[1]           # fused head lane width
    logstd_off = 64 if action_dim <= 64 else head_width // 2
    head_rows = head_width // 128

    # Batch tiling: keep a single tiny tile for micro-batches; multiple of 16
    # (clean bf16 sublane packing) otherwise, capped at 128-row grid tiles.
    if B <= 8:
        tile_b = 8
    else:
        tile_b = min(128, _round_up(B, 16))
    b_pad = _round_up(B, tile_b)
    n_tiles = b_pad // tile_b

    # Zero-pad state; padding rows/cols are inert and sliced away below.
    state_p = jnp.zeros((b_pad, k_pad), jnp.float32).at[:B, :K].set(
        state.astype(jnp.float32))

    weight_names = _weight_names(use_MLP_ReLU, use_Residual, use_LayerNorm)
    stack_rows = _stack_layout(use_MLP_ReLU, use_Residual, use_LayerNorm,
                               head_rows)
    kernel = make_actor_kernel(weight_names, stack_rows, use_MLP_ReLU,
                               use_Residual, use_LayerNorm, logstd_off)

    # Grid over batch tiles; weights/stack use constant block indices so they
    # are DMA'd once and stay resident across grid steps.
    state_spec = pl.BlockSpec((tile_b, k_pad), lambda i: (i, 0))
    weight_specs = [pl.BlockSpec(w.shape, lambda i: (0, 0)) for w in weights]
    stack_spec = pl.BlockSpec(stack.shape, lambda i: (0, 0))
    out_spec = pl.BlockSpec((tile_b, head_width), lambda i: (i, 0))

    # Advisory cost hint (static Python ints).
    flops = 2 * b_pad * k_pad * H + 2 * b_pad * H * head_width
    if use_MLP_ReLU:
        flops += 2 * b_pad * H * H
    elif use_Residual:
        flops += 2 * 2 * b_pad * H * (4 * H)
    bytes_accessed = (
        math.prod(state_p.shape) * state_p.dtype.itemsize
        + sum(math.prod(p.shape) * p.dtype.itemsize for p in packed_params)
        + b_pad * head_width * 4)
    cost = pl.CostEstimate(flops=flops,
                           transcendentals=b_pad * head_width + 4 * b_pad,
                           bytes_accessed=bytes_accessed)

    out_p = pl.pallas_call(
        kernel,
        out_shape=jax.ShapeDtypeStruct((b_pad, head_width), jnp.float32),
        grid_spec=pltpu.PrefetchScalarGridSpec(
            num_scalar_prefetch=0,
            grid=(n_tiles,),
            in_specs=[state_spec] + weight_specs + [stack_spec],
            out_specs=out_spec),
        compiler_params=pltpu.CompilerParams(
            dimension_semantics=("parallel",)),
        cost_estimate=cost,
    )(state_p, *weights, stack)

    mean = out_p[:B, :action_dim]
    log_std = out_p[:B, logstd_off:logstd_off + action_dim]
    return mean, log_std


def reference_forward(state, raw_params, *, use_MLP_ReLU=False,
                      use_Residual=False, use_LayerNorm=False):
    """Plain-JAX reference with the same numerics as the kernel
    (bf16 weights/activations at matmuls, f32 accumulation/elementwise)."""
    (w1, b1, w2, b2, lng1, lnb1, wb1, bb1, wb2, bb2,
     lng2, lnb2, w3, b3, w4, b4) = raw_params

    bf = lambda a: a.astype(jnp.bfloat16)
    dot = lambda a, w: jnp.dot(bf(a), bf(w), preferred_element_type=jnp.float32)

    def ln(x, g, b):
        mu = jnp.mean(x, axis=-1, keepdims=True)
        var = jnp.mean((x - mu) ** 2, axis=-1, keepdims=True)
        return (x - mu) * jax.lax.rsqrt(var + LN_EPS) * g + b

    x = dot(state.astype(jnp.float32), w1) + b1
    if use_MLP_ReLU:
        x = jnp.maximum(x, 0.0)
        x = jnp.maximum(dot(x, w2) + b2, 0.0)
    else:
        if use_Residual:
            r = x
            h = ln(x, lng1, lnb1)
            h = jnp.maximum(dot(h, wb1) + bb1, 0.0)
            x = dot(h, wb2) + bb2 + r
        if use_LayerNorm:
            x = ln(x, lng2, lnb2)
    mean = dot(x, w3) + b3
    ls = dot(x, w4) + b4
    ls = LOG_STD_MIN + 0.5 * (LOG_STD_MAX - LOG_STD_MIN) * (jnp.tanh(ls) + 1.0)
    return mean, ls


if __name__ == "__main__":
    key = jax.random.PRNGKey(0)
    k_state, k_state_big, k_params = jax.random.split(key, 3)

    batch = 2
    state_dim = 17      # small proprioceptive observation
    action_dim = 6

    state = jax.random.normal(k_state, (batch, state_dim), jnp.float32)
    raw_params = init_params(k_params, state_dim, action_dim)

    configs = [
        dict(use_MLP_ReLU=False, use_Residual=False, use_LayerNorm=False),
        dict(use_MLP_ReLU=False, use_Residual=True, use_LayerNorm=True),
        dict(use_MLP_ReLU=True, use_Residual=False, use_LayerNorm=False),
    ]

    for cfg in configs:
        packed = pack_params(raw_params, state_dim, action_dim, **cfg)
        mean, log_std = actor_sac_forward(state, packed,
                                          action_dim=action_dim, **cfg)
        jax.block_until_ready((mean, log_std))

        ref_mean, ref_ls = reference_forward(state, raw_params, **cfg)
        assert mean.shape == (batch, action_dim)
        assert log_std.shape == (batch, action_dim)
        assert jnp.allclose(mean, ref_mean, atol=1e-3, rtol=1e-3), cfg
        assert jnp.allclose(log_std, ref_ls, atol=1e-3, rtol=1e-3), cfg
        assert bool(jnp.all(log_std >= LOG_STD_MIN - 1e-3))
        assert bool(jnp.all(log_std <= LOG_STD_MAX + 1e-3))

    # Batched-throughput path (grid > 1): B=300 -> tile_b=128, 3 grid steps,
    # weights fetched once and kept resident across the batch tiles.
    big_batch = 300
    state_big = jax.random.normal(k_state_big, (big_batch, state_dim),
                                  jnp.float32)
    cfg = dict(use_MLP_ReLU=False, use_Residual=True, use_LayerNorm=True)
    packed = pack_params(raw_params, state_dim, action_dim, **cfg)
    mean, log_std = actor_sac_forward(state_big, packed,
                                      action_dim=action_dim, **cfg)
    jax.block_until_ready((mean, log_std))
    ref_mean, ref_ls = reference_forward(state_big, raw_params, **cfg)
    assert mean.shape == (big_batch, action_dim)
    assert log_std.shape == (big_batch, action_dim)
    assert jnp.allclose(mean, ref_mean, atol=1e-3, rtol=1e-3)
    assert jnp.allclose(log_std, ref_ls, atol=1e-3, rtol=1e-3)

    print("KERNEL_OK")
</pallas_src>

<mosaic_0001>
module attributes {stable_mosaic.version = 11 : i64} {
  func.func @kernel(%arg0: i32, %arg1: memref<8x128xf32, #tpu.memory_space<vmem>>, %arg2: memref<128x128xbf16, #tpu.memory_space<vmem>>, %arg3: memref<128x128xbf16, #tpu.memory_space<vmem>>, %arg4: memref<2x128xf32, #tpu.memory_space<vmem>>, %arg5: memref<8x128xf32, #tpu.memory_space<vmem>>) attributes {dimension_semantics = [#tpu.dimension_semantics<parallel>], iteration_bounds = array<i64: 1>, scalar_prefetch = 0 : i64, scratch_operands = 0 : i64, tpu.core_type = #tpu.core_type<tc>, window_params = [{transform_indices = @transform_0, window_bounds = array<i64: 8, 128>}, {pipeline_mode = #tpu.pipeline_mode<synchronous>, transform_indices = @transform_1, window_bounds = array<i64: 128, 128>}, {pipeline_mode = #tpu.pipeline_mode<synchronous>, transform_indices = @transform_2, window_bounds = array<i64: 128, 128>}, {pipeline_mode = #tpu.pipeline_mode<synchronous>, transform_indices = @transform_3, window_bounds = array<i64: 2, 128>}, {transform_indices = @transform_4, window_bounds = array<i64: 8, 128>}]} {
    %c0 = arith.constant 0 : index
    %c0_0 = arith.constant 0 : index
    %0 = vector.load %arg4[%c0, %c0_0] : memref<2x128xf32, #tpu.memory_space<vmem>>, vector<2x128xf32>
    %c0_1 = arith.constant 0 : index
    %c0_2 = arith.constant 0 : index
    %1 = vector.load %arg1[%c0_1, %c0_2] : memref<8x128xf32, #tpu.memory_space<vmem>>, vector<8x128xf32>
    %2 = arith.truncf %1 : vector<8x128xf32> to vector<8x128xbf16>
    %c0_3 = arith.constant 0 : index
    %c0_4 = arith.constant 0 : index
    %3 = vector.load %arg2[%c0_3, %c0_4] : memref<128x128xbf16, #tpu.memory_space<vmem>>, vector<128x128xbf16>
    %cst = arith.constant dense<0.000000e+00> : vector<8x128xf32>
    %4 = tpu.matmul %2, %3, %cst {dimension_numbers = #tpu.dot_dimension_numbers<[1], [0], [0], [1], [0, 0, 1, 1], [], []>} : vector<8x128xbf16>, vector<128x128xbf16>, vector<8x128xf32> -> vector<8x128xf32>
    %5 = vector.extract_strided_slice %0 {offsets = [0, 0], sizes = [1, 128], strides = [1, 1]} : vector<2x128xf32> to vector<1x128xf32>
    %6 = vector.broadcast %5 : vector<1x128xf32> to vector<8x128xf32>
    %7 = arith.addf %4, %6 : vector<8x128xf32>
    %8 = arith.truncf %7 : vector<8x128xf32> to vector<8x128xbf16>
    %c0_5 = arith.constant 0 : index
    %c0_6 = arith.constant 0 : index
    %9 = vector.load %arg3[%c0_5, %c0_6] : memref<128x128xbf16, #tpu.memory_space<vmem>>, vector<128x128xbf16>
    %cst_7 = arith.constant dense<0.000000e+00> : vector<8x128xf32>
    %10 = tpu.matmul %8, %9, %cst_7 {dimension_numbers = #tpu.dot_dimension_numbers<[1], [0], [0], [1], [0, 0, 1, 1], [], []>} : vector<8x128xbf16>, vector<128x128xbf16>, vector<8x128xf32> -> vector<8x128xf32>
    %11 = vector.extract_strided_slice %0 {offsets = [1, 0], sizes = [1, 128], strides = [1, 1]} : vector<2x128xf32> to vector<1x128xf32>
    %12 = vector.broadcast %11 : vector<1x128xf32> to vector<8x128xf32>
    %13 = arith.addf %10, %12 : vector<8x128xf32>
    %14 = tpu.iota {dimensions = array<i32: 1>} : vector<8x128xi32>
    %15 = math.tanh %13 : vector<8x128xf32>
    %cst_8 = arith.constant 1.100000e+01 : f32
    %16 = vector.broadcast %cst_8 : f32 to vector<8x128xf32>
    %17 = arith.mulf %16, %15 : vector<8x128xf32>
    %cst_9 = arith.constant -9.000000e+00 : f32
    %18 = vector.broadcast %cst_9 : f32 to vector<8x128xf32>
    %19 = arith.addf %18, %17 : vector<8x128xf32>
    %c64_i32 = arith.constant 64 : i32
    %20 = vector.broadcast %c64_i32 : i32 to vector<8x128xi32>
    %21 = arith.cmpi sge, %14, %20 : vector<8x128xi32>
    %22 = arith.select %21, %19, %13 : vector<8x128xi1>, vector<8x128xf32>
    %c0_10 = arith.constant 0 : index
    %c0_11 = arith.constant 0 : index
    %23 = vector.load %arg5[%c0_10, %c0_11] : memref<8x128xf32, #tpu.memory_space<vmem>>, vector<8x128xf32>
    tpu.vector_store %arg5[%c0_10, %c0_11], %22 {strides = array<i32>} : memref<8x128xf32, #tpu.memory_space<vmem>>, vector<8x128xf32>,
    return
  }
  func.func @transform_0(%arg0: i32) -> (i32, i32) {
    %c0_i32 = arith.constant 0 : i32
    %c0_i32_0 = arith.constant 0 : i32
    return %arg0, %c0_i32 : i32, i32
  }
  func.func @transform_1(%arg0: i32) -> (i32, i32) {
    %c0_i32 = arith.constant 0 : i32
    %c0_i32_0 = arith.constant 0 : i32
    %c0_i32_1 = arith.constant 0 : i32
    return %c0_i32, %c0_i32_0 : i32, i32
  }
  func.func @transform_2(%arg0: i32) -> (i32, i32) {
    %c0_i32 = arith.constant 0 : i32
    %c0_i32_0 = arith.constant 0 : i32
    %c0_i32_1 = arith.constant 0 : i32
    return %c0_i32, %c0_i32_0 : i32, i32
  }
  func.func @transform_3(%arg0: i32) -> (i32, i32) {
    %c0_i32 = arith.constant 0 : i32
    %c0_i32_0 = arith.constant 0 : i32
    %c0_i32_1 = arith.constant 0 : i32
    return %c0_i32, %c0_i32_0 : i32, i32
  }
  func.func @transform_4(%arg0: i32) -> (i32, i32) {
    %c0_i32 = arith.constant 0 : i32
    %c0_i32_0 = arith.constant 0 : i32
    return %arg0, %c0_i32 : i32, i32
  }
}

</mosaic_0001>

<bundles_post_ra>
// kernel: actor_sac_forward.1
= control target key start
LH: loop header
LB: loop body
LE: loop exit
PB: predicated region body
PF: predicated region fallthrough
CT: control target
= control target key end

     0   :  { %9 = vsyncpa [#allocation3], 0  ;;  %s490_s0 = inlined_call_operand.vmem [shape: f32[8,128], index: 0, kind: input, shape index: {}]   ;;  %s491_s1 = inlined_call_operand.hbm [shape: bf16[128,128], index: 1, kind: input, shape index: {}]   ;;  %s492_s2 = inlined_call_operand.hbm [shape: bf16[128,128], index: 2, kind: input, shape index: {}]   ;;  %s493_s3 = inlined_call_operand.vmem [shape: f32[2,128], index: 3, kind: input, shape index: {}]   ;;  %s494_s4 = inlined_call_operand.vmem [shape: f32[8,128], index: 4, kind: output, shape index: {}]  }
   0x1   :  { %10 = vsyncpa [#allocation5], 0  ;;  %s426_s15 = smov [#allocation2]   ;;  %s378_s19 = scalar_lea.hbm %s491_s1, 1024 }
   0x2   :  { %s18_s16 = sshll.u32 %s426_s15, 4  ;;  %p379_p0 = scmp.ne.s32.totalorder %s491_s1, %s378_s19  ;;  %s19_s16 = int_to_ptr.vmem [resolvable:$true] %s18_s16 }
   0x3   :  { %p382_p1 = scmp.lt.u32.totalorder %s378_s19, %s491_s1 }
   0x5   :  { %p384_p2 = pnand %p382_p1, %p379_p0 }
   0x7   :  { %387 = shalt.err (!%p384_p2)
}
   0x8   :  { %s388_s24 = scalar_lea.vmem %s19_s16, 1024  ;;  %p393_p4 = scmp.lt.s32.totalorder %s19_s16, %s19_s16 }
   0x9   :  { %p389_p3 = scmp.ne.s32.totalorder %s19_s16, %s388_s24  ;;  %p394_p5 = scmp.lt.s32.totalorder %s388_s24, %s388_s24 }
   0xb   :  { %p395_p6 = por %p394_p5, %p393_p4 }
   0xd   :  { %p396_p7 = pnand %p395_p6, %p389_p3 }
   0xf   :  { %399 = shalt.err (!%p396_p7)
}
  0x10   :  { %s427_s25 = smov 64   ;;  %s428_s26 = smov 4  }
  0x11   :  { %24 = dma.hbm_to_vmem [thread:$0]  %s491_s1, 1024, %s19_s16, [#allocation3], %s427_s25, %s427_s25, %s428_s26  }
  0x12   :  { %s429_s29 = smov [#allocation4]   ;;  %s400_s7 = scalar_lea.hbm %s492_s2, 1024 }
  0x13   :  { %s30_s30 = sshll.u32 %s429_s29, 4  ;;  %p401_p8 = scmp.ne.s32.totalorder %s492_s2, %s400_s7  ;;  %s31_s30 = int_to_ptr.vmem [resolvable:$true] %s30_s30 }
  0x14   :  { %p404_p9 = scmp.lt.u32.totalorder %s400_s7, %s492_s2 }
  0x16   :  { %p406_p10 = pnand %p404_p9, %p401_p8 }
  0x18   :  { %409 = shalt.err (!%p406_p10)
}
  0x19   :  { %s410_s12 = scalar_lea.vmem %s31_s30, 1024  ;;  %p415_p12 = scmp.lt.s32.totalorder %s31_s30, %s31_s30 }
  0x1a   :  { %p411_p11 = scmp.ne.s32.totalorder %s31_s30, %s410_s12  ;;  %p416_p13 = scmp.lt.s32.totalorder %s410_s12, %s410_s12 }
  0x1c   :  { %p417_p0 = por %p416_p13, %p415_p12 }
  0x1e   :  { %p418_p1 = pnand %p417_p0, %p411_p11 }
  0x20   :  { %421 = shalt.err (!%p418_p1)
}
  0x21   :  { %36 = dma.hbm_to_vmem [thread:$0]  %s492_s2, 1024, %s31_s30, [#allocation5], %s427_s25, %s427_s25, %s428_s26  }
  0x22   :  { %422 = dma.done.wait [#allocation3], 1024  }
  0x23   :  { %423 = vsyncadd [#allocation3], 4294966272 }
  0x24   :  { %424 = dma.done.wait [#allocation5], 1024  }
  0x25   :  { %425 = vsyncadd [#allocation5], 4294966272  ;;  %v430_v0 = vmov 0.0   ;;  %vm431_vm0 = vmmov 0   ;;  %v360_v1 = vld [vmem:[#allocation2] sm:$0xff]   ;;  %v361_v2 = vld [vmem:[#allocation2 + $0x8] sm:$0xff]   ;;  %v65_v19 = vlaneseq }
  0x26   :  { %314 = vmatprep.subr.bf16.mxu0 %v430_v0  ;;  %330 = vmatprep.mubr.msk.bf16.mxu0 %vm431_vm0, %v430_v0  ;;  %v362_v3 = vld [vmem:[#allocation2 + $0x10] sm:$0xff]   ;;  %v368_v4 = vld [vmem:[#allocation4] sm:$0xff]   ;;  %v363_v5 = vld [vmem:[#allocation2 + $0x18] sm:$0xff]  }
  0x27   :  { %334 = vmatprep.subr.bf16.mxu1 %v430_v0  ;;  %350 = vmatprep.mubr.msk.bf16.mxu1 %vm431_vm0, %v430_v0  ;;  %v369_v6 = vld [vmem:[#allocation4 + $0x8] sm:$0xff]   ;;  %v364_v7 = vld [vmem:[#allocation2 + $0x20] sm:$0xff]   ;;  %v370_v8 = vld [vmem:[#allocation4 + $0x10] sm:$0xff]   ;;  %v66_v20 = vshrl.u32 %v65_v19, 7  ;;  %v267_v37 = vand.u32 127, %v65_v19 }
  0x28   :  { %315 = vmatpush3.bf16.msra.mxu0 %v360_v1  ;;  %335 = vmatpush3.bf16.msra.mxu1 %v368_v4  ;;  %v365_v9 = vld [vmem:[#allocation2 + $0x28] sm:$0xff]   ;;  %v371_v10 = vld [vmem:[#allocation4 + $0x18] sm:$0xff]   ;;  %v366_v11 = vld [vmem:[#allocation2 + $0x30] sm:$0xff]  }
  0x29   :  { %316 = vmatprep.subr.bf16.mxu0 %v430_v0  ;;  %336 = vmatprep.subr.bf16.mxu1 %v430_v0  ;;  %v372_v12 = vld [vmem:[#allocation4 + $0x20] sm:$0xff]   ;;  %v367_v13 = vld [vmem:[#allocation2 + $0x38] sm:$0xff]   ;;  %v373_v15 = vld [vmem:[#allocation4 + $0x28] sm:$0xff]   ;;  %v67_v21 = vsub.s32 0, %v66_v20  ;;  %v176_v30 = vsub.s32 1, %v66_v20  ;;  %vm271_vm1 = vcmp.ge.s32.totalorder %v267_v37, 64 }
  0x2a   :  { %v47_v14 = vld [vmem:[%s490_s0] sm:$0xff]  ;;  %v374_v17 = vld [vmem:[#allocation4 + $0x30] sm:$0xff]   ;;  %v375_v18 = vld [vmem:[#allocation4 + $0x38] sm:$0xff]  }
  0x2b   :  { %v48_v16 = vpack.c.bf16 %v47_v14, %v47_v14  ;;  %v46_v22 = vld [vmem:[%s493_s3] sm:$0x3] }
  0x2c   :  { %317 = vmatpush3.bf16.msra.mxu0 %v361_v2  ;;  %337 = vmatpush3.bf16.msra.mxu1 %v369_v6  ;;  %v68_v23 = vrot.slane %v46_v22, %v67_v21  ;;  %v177_v31 = vrot.slane %v46_v22, %v176_v30 }
  0x2d   :  { %318 = vmatprep.subr.bf16.mxu0 %v430_v0  ;;  %338 = vmatprep.subr.bf16.mxu1 %v430_v0 }
  0x30   :  { %319 = vmatpush3.bf16.msra.mxu0 %v362_v3  ;;  %339 = vmatpush3.bf16.msra.mxu1 %v370_v8 }
  0x31   :  { %320 = vmatprep.subr.bf16.mxu0 %v430_v0  ;;  %340 = vmatprep.subr.bf16.mxu1 %v430_v0 }
  0x34   :  { %321 = vmatpush3.bf16.msra.mxu0 %v363_v5  ;;  %341 = vmatpush3.bf16.msra.mxu1 %v371_v10 }
  0x35   :  { %322 = vmatprep.subr.bf16.mxu0 %v430_v0  ;;  %342 = vmatprep.subr.bf16.mxu1 %v430_v0 }
  0x38   :  { %323 = vmatpush3.bf16.msra.mxu0 %v364_v7  ;;  %343 = vmatpush3.bf16.msra.mxu1 %v372_v12 }
  0x39   :  { %324 = vmatprep.subr.bf16.mxu0 %v430_v0  ;;  %344 = vmatprep.subr.bf16.mxu1 %v430_v0 }
  0x3c   :  { %325 = vmatpush3.bf16.msra.mxu0 %v365_v9  ;;  %345 = vmatpush3.bf16.msra.mxu1 %v373_v15 }
  0x3d   :  { %326 = vmatprep.subr.bf16.mxu0 %v430_v0  ;;  %346 = vmatprep.subr.bf16.mxu1 %v430_v0 }
  0x40   :  { %327 = vmatpush3.bf16.msra.mxu0 %v366_v11  ;;  %347 = vmatpush3.bf16.msra.mxu1 %v374_v17 }
  0x41   :  { %328 = vmatprep.subr.bf16.mxu0 %v430_v0  ;;  %348 = vmatprep.subr.bf16.mxu1 %v430_v0 }
  0x44   :  { %329 = vmatpush3.bf16.msra.mxu0 %v367_v13  ;;  %349 = vmatpush3.bf16.msra.mxu1 %v375_v18 }
  0x47   :  { %331 = vmatmul.mubr.bf16.vlgmr.msra.gmra.mrb[0].mxu0 %v48_v16 }
 0x11a   :  { %v151_v24 = vpop.f32.mrb[0].mxu0 }
 0x11b   :  { %v152_v25 = vadd.f32 %v151_v24, %v68_v23  ;;  %v332_v26 = vpop.f32.mrb[1].mxu0 }
 0x11c   :  { %v154_v27 = vpop.f32.mrb[2].mxu0 }
 0x11d   :  { %v157_v28 = vpack.c.bf16 %v152_v25, %v152_v25  ;;  %v333_v29 = vpop.f32.mrb[3].mxu0 }
 0x11f   :  { %351 = vmatmul.mubr.bf16.vlgmr.msra.gmra.mrb[0].mxu1 %v157_v28 }
 0x1f2   :  { %v260_v32 = vpop.f32.mrb[0].mxu1 }
 0x1f3   :  { %v261_v33 = vadd.f32 %v260_v32, %v177_v31  ;;  %v352_v34 = vpop.f32.mrb[1].mxu1 }
 0x1f4   :  { %v263_v35 = vpop.f32.mrb[2].mxu1 }
 0x1f5   :  { %376 = vtanh.f32 %v261_v33  ;;  %v353_v36 = vpop.f32.mrb[3].mxu1 }
 0x1ff   :  { %v377_v38 = vpop.eup %376 }
 0x200   :  { %v269_v39 = vmul.f32 11.0, %v377_v38 }
 0x202   :  { %v270_v40 = vadd.f32 -9.0, %v269_v39 }
 0x204   :  { %v272_v41 = vsel %vm271_vm1, %v270_v40, %v261_v33 }
 0x205   :  { %273 = vst [vmem:[%s494_s4] sm:$0xff] %v272_v41 }
 0x206   :  { %278 = vsyncpa [#allocation3], 1 }
 0x207   :  { %279 = vsyncpa [#allocation5], 1 }

</bundles_post_ra>
